<compile_context>
chip_gen: v7x
topology: tpu7x:2x2x1
jax: 0.10.0
libtpu: 0.0.40
codegen_flags: <defaults>
</compile_context>

<pallas_src>
import functools

import jax
import jax.numpy as jnp
from jax import lax
from jax.experimental import pallas as pl
from jax.experimental.pallas import tpu as pltpu


def _dwconv_kernel(x_ref, w_dw_ref, w_pwb_ref, out_ref, *, kh, kw, row_stride, hw):
    """One batch element, spatially flattened (lane-dense).

    x_ref    : (1, C_in, hw + tail)  flattened input, zero tail padding
    w_dw_ref : (C_in, kh*kw)         depthwise taps
    w_pwb_ref: (C_out, C_in + 1)     [pointwise weight | folded bias]
    out_ref  : (1, C_out, hw)        flattened output grid (valid window is
                                     cropped by the caller, XLA-side)
    """
    x = x_ref[0]                                     # (C_in, hw + tail)
    cin = x.shape[0]
    w_dw = w_dw_ref[...]                             # (C_in, kh*kw)

    # Depthwise conv: accumulate kh*kw shifted full-width lane windows.
    # (Static lane-window slices; the depthwise bias is folded into the
    #  pointwise bias on the host, so no per-element bias add here.)
    acc = x[:, 0:hw] * w_dw[:, 0:1]
    for a in range(kh):
        for b in range(kw):
            t = a * kw + b
            if t == 0:
                continue
            s = a * row_stride + b
            acc = acc + x[:, s:s + hw] * w_dw[:, t:t + 1]

    # Pointwise 1x1 conv: channel mixing as one MXU matmul with a wide,
    # lane-dense N = hw, plus the pre-folded bias.
    w_pwb = w_pwb_ref[...]
    z = jnp.dot(w_pwb[:, :cin], acc, preferred_element_type=jnp.float32)
    out_ref[0] = (z + w_pwb[:, cin:]).astype(out_ref.dtype)


def dwconv2d(x, w_dw, b_dw, w_pw, b_pw):
    """DWConv('two', ...): x (B, C_in, H, W) -> (B, C_out, H-kh+1, W-kw+1).

    w_dw: (C_in, kh, kw) depthwise weight (groups=C_in), b_dw: (C_in,)
    w_pw: (C_out, C_in)  pointwise 1x1 weight,           b_pw: (C_out,)
    """
    # TODO(synk): only the module defaults padding=0, dilation=(1,1) are implemented.
    B, cin, H, W = x.shape
    cout, kh, kw = w_pw.shape[0], w_dw.shape[1], w_dw.shape[2]
    ho, wo = H - kh + 1, W - kw + 1
    hw = H * W
    tail = (kh - 1) * W + (kw - 1)

    # Host-side folding / packing (exact):
    #   pointwise(depthwise(x) + b_dw) = W_pw @ depthwise(x) + (b_pw + W_pw @ b_dw)
    b_eff = (b_pw + w_pw @ b_dw).astype(jnp.float32)
    w_pwb = jnp.concatenate([w_pw, b_eff[:, None]], axis=1)   # (C_out, C_in+1)
    w_dw_flat = w_dw.reshape(cin, kh * kw)

    # Lane-dense layout: flatten (H, W) into the lane axis and append `tail`
    # zeros so every depthwise tap is a full hw-wide lane window.
    x_flat = jnp.pad(x.reshape(B, cin, hw), ((0, 0), (0, 0), (0, tail)))

    kernel = functools.partial(_dwconv_kernel, kh=kh, kw=kw, row_stride=W, hw=hw)
    out_flat = pl.pallas_call(
        kernel,
        out_shape=jax.ShapeDtypeStruct((B, cout, hw), x.dtype),
        grid=(B,),
        in_specs=[
            pl.BlockSpec((1, cin, hw + tail), lambda i: (i, 0, 0)),
            pl.BlockSpec((cin, kh * kw), lambda i: (0, 0)),
            pl.BlockSpec((cout, cin + 1), lambda i: (0, 0)),
        ],
        out_specs=pl.BlockSpec((1, cout, hw), lambda i: (i, 0, 0)),
        compiler_params=pltpu.CompilerParams(
            dimension_semantics=("parallel",)),
    )(x_flat, w_dw_flat, w_pwb)

    # Un-flatten and crop to the valid convolution window (XLA-side layout
    # plumbing; keeps the kernel's stores wide and lane-dense).
    return out_flat.reshape(B, cout, H, W)[:, :, :ho, :wo]


def dwconv1d(x, w_dw, b_dw, w_pw, b_pw):
    """DWConv('one', ...): x (B, C_in, L) -> (B, C_out, L-k+1).  w_dw: (C_in, k)."""
    out = dwconv2d(x[:, :, None, :], w_dw[:, None, :], b_dw, w_pw, b_pw)
    return out[:, :, 0, :]


# ------------------------- pure-JAX reference (for checking) -------------------------
def ref_dwconv2d(x, w_dw, b_dw, w_pw, b_pw):
    B, cin, H, W = x.shape
    cout, kh, kw = w_pw.shape[0], w_dw.shape[1], w_dw.shape[2]
    dn = ("NCHW", "OIHW", "NCHW")
    y = lax.conv_general_dilated(
        x, w_dw.reshape(cin, 1, kh, kw), (1, 1), "VALID",
        dimension_numbers=dn, feature_group_count=cin)
    y = y + b_dw.reshape(1, cin, 1, 1)
    return jnp.einsum("oc,bchw->bohw", w_pw, y) + b_pw.reshape(1, cout, 1, 1)


if __name__ == "__main__":
    key = jax.random.PRNGKey(0)
    kx, kx1, kp1, kp2, kp3 = jax.random.split(key, 5)

    def make_params(k, cin, cout, kh, kw):
        k0, k1, k2, k3 = jax.random.split(k, 4)
        rn = lambda kk, shp: 0.3 * jax.random.normal(kk, shp, jnp.float32)
        return rn(k0, (cin, kh, kw)), rn(k1, (cin,)), rn(k2, (cout, cin)), rn(k3, (cout,))

    # --- DWConv('two', 4, 8, kernel_size=(3, 3)) on x [2, 4, 16, 16] ---
    B, C, H, W = 2, 4, 16, 16
    x = jax.random.normal(kx, (B, C, H, W), jnp.float32)
    w_dw, b_dw, w_pw, b_pw = make_params(kp1, C, 8, 3, 3)
    out = jax.block_until_ready(dwconv2d(x, w_dw, b_dw, w_pw, b_pw))
    ref = ref_dwconv2d(x, w_dw, b_dw, w_pw, b_pw)
    assert out.shape == (B, 8, H - 2, W - 2)
    assert jnp.allclose(out, ref, atol=1e-3, rtol=1e-3), float(jnp.max(jnp.abs(out - ref)))

    # --- DWConv('two', 4, 4, kernel_size=(3, 1)) : bc_resnet frequency conv ---
    w_dw, b_dw, w_pw, b_pw = make_params(kp2, C, C, 3, 1)
    out = jax.block_until_ready(dwconv2d(x, w_dw, b_dw, w_pw, b_pw))
    ref = ref_dwconv2d(x, w_dw, b_dw, w_pw, b_pw)
    assert out.shape == (B, C, H - 2, W)
    assert jnp.allclose(out, ref, atol=1e-3, rtol=1e-3), float(jnp.max(jnp.abs(out - ref)))

    # --- DWConv('one', 4, 8, kernel_size=3) : bc_resnet temporal conv ---
    L = 64
    x1 = jax.random.normal(kx1, (B, C, L), jnp.float32)
    w_dw1, b_dw1, w_pw1, b_pw1 = make_params(kp3, C, 8, 1, 3)
    out1 = jax.block_until_ready(dwconv1d(x1, w_dw1[:, 0, :], b_dw1, w_pw1, b_pw1))
    ref1 = ref_dwconv2d(x1[:, :, None, :], w_dw1, b_dw1, w_pw1, b_pw1)[:, :, 0, :]
    assert out1.shape == (B, 8, L - 2)
    assert jnp.allclose(out1, ref1, atol=1e-3, rtol=1e-3), float(jnp.max(jnp.abs(out1 - ref1)))

    print("KERNEL_OK")
</pallas_src>

<mosaic_0001>
module attributes {stable_mosaic.version = 11 : i64} {
  func.func @_dwconv_kernel(%arg0: i32, %arg1: memref<1x4x290xf32, #tpu.memory_space<vmem>>, %arg2: memref<4x9xf32, #tpu.memory_space<vmem>>, %arg3: memref<8x5xf32, #tpu.memory_space<vmem>>, %arg4: memref<1x8x256xf32, #tpu.memory_space<vmem>>) attributes {dimension_semantics = [#tpu.dimension_semantics<parallel>], iteration_bounds = array<i64: 2>, scalar_prefetch = 0 : i64, scratch_operands = 0 : i64, tpu.core_type = #tpu.core_type<tc>, window_params = [{transform_indices = @transform_0, window_bounds = array<i64: 1, 4, 290>}, {pipeline_mode = #tpu.pipeline_mode<synchronous>, transform_indices = @transform_1, window_bounds = array<i64: 4, 9>}, {pipeline_mode = #tpu.pipeline_mode<synchronous>, transform_indices = @transform_2, window_bounds = array<i64: 8, 5>}, {transform_indices = @transform_3, window_bounds = array<i64: 1, 8, 256>}]} {
    %c0 = arith.constant 0 : index
    %c0_0 = arith.constant 0 : index
    %c0_1 = arith.constant 0 : index
    %0 = vector.load %arg1[%c0, %c0_0, %c0_1] : memref<1x4x290xf32, #tpu.memory_space<vmem>>, vector<1x4x290xf32>
    %1 = vector.shape_cast %0 : vector<1x4x290xf32> to vector<4x290xf32>
    %c0_2 = arith.constant 0 : index
    %c0_3 = arith.constant 0 : index
    %2 = vector.load %arg2[%c0_2, %c0_3] : memref<4x9xf32, #tpu.memory_space<vmem>>, vector<4x9xf32>
    %3 = vector.extract_strided_slice %1 {offsets = [0, 0], sizes = [4, 256], strides = [1, 1]} : vector<4x290xf32> to vector<4x256xf32>
    %4 = vector.extract_strided_slice %2 {offsets = [0, 0], sizes = [4, 1], strides = [1, 1]} : vector<4x9xf32> to vector<4x1xf32>
    %5 = vector.broadcast %4 : vector<4x1xf32> to vector<4x256xf32>
    %6 = arith.mulf %3, %5 : vector<4x256xf32>
    %7 = vector.extract_strided_slice %1 {offsets = [0, 1], sizes = [4, 256], strides = [1, 1]} : vector<4x290xf32> to vector<4x256xf32>
    %8 = vector.extract_strided_slice %2 {offsets = [0, 1], sizes = [4, 1], strides = [1, 1]} : vector<4x9xf32> to vector<4x1xf32>
    %9 = vector.broadcast %8 : vector<4x1xf32> to vector<4x256xf32>
    %10 = arith.mulf %7, %9 : vector<4x256xf32>
    %11 = arith.addf %6, %10 : vector<4x256xf32>
    %12 = vector.extract_strided_slice %1 {offsets = [0, 2], sizes = [4, 256], strides = [1, 1]} : vector<4x290xf32> to vector<4x256xf32>
    %13 = vector.extract_strided_slice %2 {offsets = [0, 2], sizes = [4, 1], strides = [1, 1]} : vector<4x9xf32> to vector<4x1xf32>
    %14 = vector.broadcast %13 : vector<4x1xf32> to vector<4x256xf32>
    %15 = arith.mulf %12, %14 : vector<4x256xf32>
    %16 = arith.addf %11, %15 : vector<4x256xf32>
    %17 = vector.extract_strided_slice %1 {offsets = [0, 16], sizes = [4, 256], strides = [1, 1]} : vector<4x290xf32> to vector<4x256xf32>
    %18 = vector.extract_strided_slice %2 {offsets = [0, 3], sizes = [4, 1], strides = [1, 1]} : vector<4x9xf32> to vector<4x1xf32>
    %19 = vector.broadcast %18 : vector<4x1xf32> to vector<4x256xf32>
    %20 = arith.mulf %17, %19 : vector<4x256xf32>
    %21 = arith.addf %16, %20 : vector<4x256xf32>
    %22 = vector.extract_strided_slice %1 {offsets = [0, 17], sizes = [4, 256], strides = [1, 1]} : vector<4x290xf32> to vector<4x256xf32>
    %23 = vector.extract_strided_slice %2 {offsets = [0, 4], sizes = [4, 1], strides = [1, 1]} : vector<4x9xf32> to vector<4x1xf32>
    %24 = vector.broadcast %23 : vector<4x1xf32> to vector<4x256xf32>
    %25 = arith.mulf %22, %24 : vector<4x256xf32>
    %26 = arith.addf %21, %25 : vector<4x256xf32>
    %27 = vector.extract_strided_slice %1 {offsets = [0, 18], sizes = [4, 256], strides = [1, 1]} : vector<4x290xf32> to vector<4x256xf32>
    %28 = vector.extract_strided_slice %2 {offsets = [0, 5], sizes = [4, 1], strides = [1, 1]} : vector<4x9xf32> to vector<4x1xf32>
    %29 = vector.broadcast %28 : vector<4x1xf32> to vector<4x256xf32>
    %30 = arith.mulf %27, %29 : vector<4x256xf32>
    %31 = arith.addf %26, %30 : vector<4x256xf32>
    %32 = vector.extract_strided_slice %1 {offsets = [0, 32], sizes = [4, 256], strides = [1, 1]} : vector<4x290xf32> to vector<4x256xf32>
    %33 = vector.extract_strided_slice %2 {offsets = [0, 6], sizes = [4, 1], strides = [1, 1]} : vector<4x9xf32> to vector<4x1xf32>
    %34 = vector.broadcast %33 : vector<4x1xf32> to vector<4x256xf32>
    %35 = arith.mulf %32, %34 : vector<4x256xf32>
    %36 = arith.addf %31, %35 : vector<4x256xf32>
    %37 = vector.extract_strided_slice %1 {offsets = [0, 33], sizes = [4, 256], strides = [1, 1]} : vector<4x290xf32> to vector<4x256xf32>
    %38 = vector.extract_strided_slice %2 {offsets = [0, 7], sizes = [4, 1], strides = [1, 1]} : vector<4x9xf32> to vector<4x1xf32>
    %39 = vector.broadcast %38 : vector<4x1xf32> to vector<4x256xf32>
    %40 = arith.mulf %37, %39 : vector<4x256xf32>
    %41 = arith.addf %36, %40 : vector<4x256xf32>
    %42 = vector.extract_strided_slice %1 {offsets = [0, 34], sizes = [4, 256], strides = [1, 1]} : vector<4x290xf32> to vector<4x256xf32>
    %43 = vector.extract_strided_slice %2 {offsets = [0, 8], sizes = [4, 1], strides = [1, 1]} : vector<4x9xf32> to vector<4x1xf32>
    %44 = vector.broadcast %43 : vector<4x1xf32> to vector<4x256xf32>
    %45 = arith.mulf %42, %44 : vector<4x256xf32>
    %46 = arith.addf %41, %45 : vector<4x256xf32>
    %c0_4 = arith.constant 0 : index
    %c0_5 = arith.constant 0 : index
    %47 = vector.load %arg3[%c0_4, %c0_5] : memref<8x5xf32, #tpu.memory_space<vmem>>, vector<8x5xf32>
    %48 = vector.extract_strided_slice %47 {offsets = [0, 0], sizes = [8, 4], strides = [1, 1]} : vector<8x5xf32> to vector<8x4xf32>
    %cst = arith.constant dense<0.000000e+00> : vector<8x256xf32>
    %49 = tpu.matmul %48, %46, %cst {dimension_numbers = #tpu.dot_dimension_numbers<[1], [0], [0], [1], [0, 0, 1, 1], [], []>} : vector<8x4xf32>, vector<4x256xf32>, vector<8x256xf32> -> vector<8x256xf32>
    %50 = vector.extract_strided_slice %47 {offsets = [0, 4], sizes = [8, 1], strides = [1, 1]} : vector<8x5xf32> to vector<8x1xf32>
    %51 = vector.broadcast %50 : vector<8x1xf32> to vector<8x256xf32>
    %52 = arith.addf %49, %51 : vector<8x256xf32>
    %c0_6 = arith.constant 0 : index
    %c0_7 = arith.constant 0 : index
    %c0_8 = arith.constant 0 : index
    %53 = vector.load %arg4[%c0_6, %c0_7, %c0_8] : memref<1x8x256xf32, #tpu.memory_space<vmem>>, vector<1x8x256xf32>
    %54 = vector.shape_cast %53 : vector<1x8x256xf32> to vector<8x256xf32>
    %55 = vector.shape_cast %52 : vector<8x256xf32> to vector<1x8x256xf32>
    tpu.vector_store %arg4[%c0_6, %c0_7, %c0_8], %55 {strides = array<i32>} : memref<1x8x256xf32, #tpu.memory_space<vmem>>, vector<1x8x256xf32>,
    return
  }
  func.func @transform_0(%arg0: i32) -> (i32, i32, i32) {
    %c0_i32 = arith.constant 0 : i32
    %c0_i32_0 = arith.constant 0 : i32
    %c0_i32_1 = arith.constant 0 : i32
    return %arg0, %c0_i32, %c0_i32_0 : i32, i32, i32
  }
  func.func @transform_1(%arg0: i32) -> (i32, i32) {
    %c0_i32 = arith.constant 0 : i32
    %c0_i32_0 = arith.constant 0 : i32
    %c0_i32_1 = arith.constant 0 : i32
    return %c0_i32, %c0_i32_0 : i32, i32
  }
  func.func @transform_2(%arg0: i32) -> (i32, i32) {
    %c0_i32 = arith.constant 0 : i32
    %c0_i32_0 = arith.constant 0 : i32
    %c0_i32_1 = arith.constant 0 : i32
    return %c0_i32, %c0_i32_0 : i32, i32
  }
  func.func @transform_3(%arg0: i32) -> (i32, i32, i32) {
    %c0_i32 = arith.constant 0 : i32
    %c0_i32_0 = arith.constant 0 : i32
    %c0_i32_1 = arith.constant 0 : i32
    return %arg0, %c0_i32, %c0_i32_0 : i32, i32, i32
  }
}

</mosaic_0001>

<bundles_post_ra>
// kernel: tpu_custom_call.1
= control target key start
LH: loop header
LB: loop body
LE: loop exit
PB: predicated region body
PF: predicated region fallthrough
CT: control target
= control target key end

     0   :  { %8 = vsyncpa [#allocation3], 0  ;;  %s1192_s0 = inlined_call_operand.hbm [shape: f32[2,4,290], index: 0, kind: input, shape index: {}]   ;;  %s1193_s1 = inlined_call_operand.hbm [shape: f32[4,9], index: 1, kind: input, shape index: {}]   ;;  %s1194_s2 = inlined_call_operand.hbm [shape: f32[8,5], index: 2, kind: input, shape index: {}]   ;;  %s1195_s3 = inlined_call_operand.hbm [shape: f32[2,8,256], index: 3, kind: output, shape index: {}]  }
   0x1   :  { %10 = vsyncpa [#allocation3 + $0x1], 0 }
   0x2   :  { %11 = vsyncpa [#allocation6], 0 }
   0x3   :  { %12 = vsyncpa [#allocation4], 0 }
   0x4   :  { %14 = vsyncpa [#allocation4 + $0x1], 0  ;;  %s948_s12 = smov 0   ;;  %s950_s13 = smov 0  }
   0x5   :  { %s952_s14 = smov 0   ;;  %s954_s15 = smov 0  }
   0x6 LB: > { %s969_s16 = sadd.s32 4294967295, %s903_s15   ;;  %s629_s17 = sadd.s32 4294967294, %s903_s15   ;;  %s903_s15 = sphi %s954_s15, %s1215_s15   ;;  %s899_s14 = sphi %s952_s14, %s1214_s14   ;;  %s895_s13 = sphi %s950_s13, %s1213_s13   ;;  %s891_s12 = sphi %s948_s12, %s1212_s12  }
   0x7   : > { %p40_p0 = scmp.ne.s32.totalorder %s895_s13, %s891_s12  ;;  %p1196_p1 = scmp.eq.s32.totalorder %s969_s16, 0 }
   0x8   : > { %p112_p3 = scmp.eq.s32.totalorder %s629_s17, 1  ;;  %p630_p5 = scmp.ge.s32.totalorder %s903_s15, 1 }
   0x9   : > { %p978_p4 = por %p1196_p1, %p40_p0  ;;  %p119_p7 = scmp.lt.s32.totalorder %s903_s15, 3 }
   0xa   : > { %p983_p6 = por %p112_p3, %p40_p0  ;;  %s905_s21 = smov [#allocation5]  }
   0xb   : > { %s1199_s18 = scalar_select %p978_p4, 1, 0 }
   0xc   : > { %s1200_s19 = scalar_select %p983_p6, 1, 0 }
   0xd   : > { %p988_p8 = pnand %p630_p5, %p119_p7  ;;  %s132_s22 = sshll.u32 %s905_s21, 4  ;;  %s133_s22 = int_to_ptr.vmem [resolvable:$true] %s132_s22 }
   0xe   : > { %s906_s23 = smov [#allocation7]   ;;  %s1004_s26 = sadd.s32 1, %s903_s15  }
   0xf   : > { %s1201_s20 = scalar_select %p988_p8, 1, 0 }
  0x10   : > { %p663_p10 = pneg %p988_p8  ;;  %s143_s24 = sshll.u32 %s906_s23, 4  ;;  %s1001_s24 = int_to_ptr.vmem [resolvable:$true] %s143_s24 }
  0x11   : > { %s24_s27 = ssub.s32 %s903_s15, %s1004_s26  ;;  %s747_s30 = scalar_lea.hbm %s1193_s1, 64 }
  0x12   : > { %p997_p11 = pnand %p663_p10, %p1196_p1  ;;  %p748_p12 = scmp.ne.s32.totalorder %s1193_s1, %s747_s30 }
  0x13   : > { %p754_p5 = scmp.lt.u32.totalorder %s747_s30, %s1193_s1 }
  0x14   : > { %p749_p13 = pneg %p997_p11 }
  0x16   : > { %p750_p0 = pnand %p749_p13, %p748_p12 }
  0x18   : > { %p751_p3 = pneg %p750_p0 }
  0x1a   : > { %p756_p7 = pnand %p754_p5, %p751_p3 }
  0x1c   : > { %759 = shalt.err (!%p756_p7)
}
  0x1d   : > { %s760_s8 = scalar_lea.vmem %s133_s22, 64  ;;  %p768_p2 = scmp.lt.s32.totalorder %s133_s22, %s133_s22 }
  0x1e   : > { %p761_p10 = scmp.ne.s32.totalorder %s133_s22, %s760_s8  ;;  %p769_p6 = scmp.lt.s32.totalorder %s760_s8, %s760_s8 }
  0x20   : > { %p763_p9 = pnand %p761_p10, %p749_p13  ;;  %p770_p4 = por %p769_p6, %p768_p2 }
  0x22   : > { %p764_p1 = pneg %p763_p9 }
  0x24   : > { %p771_p8 = pnand %p770_p4, %p764_p1 }
  0x26   : > { %774 = shalt.err (!%p771_p8)
}
  0x27   : > { %666 = dma.hbm_to_vmem [thread:$0]  (!%p997_p11), %s1193_s1, 64, %s133_s22, [#allocation6]  }
  0x28   : > { %s775_s21 = scalar_lea.hbm %s1194_s2, 128 }
  0x29   : > { %p776_p9 = scmp.ne.s32.totalorder %s1194_s2, %s775_s21  ;;  %p782_p4 = scmp.lt.u32.totalorder %s775_s21, %s1194_s2 }
  0x2b   : > { %p778_p2 = pnand %p776_p9, %p749_p13 }
  0x2d   : > { %p779_p1 = pneg %p778_p2 }
  0x2f   : > { %p784_p6 = pnand %p782_p4, %p779_p1 }
  0x31   : > { %787 = shalt.err (!%p784_p6)
}
  0x32   : > { %s788_s22 = scalar_lea.vmem %s1001_s24, 128  ;;  %p796_p3 = scmp.lt.s32.totalorder %s1001_s24, %s1001_s24 }
  0x33   : > { %p789_p8 = scmp.ne.s32.totalorder %s1001_s24, %s788_s22  ;;  %p797_p5 = scmp.lt.s32.totalorder %s788_s22, %s788_s22 }
  0x35   : > { %p791_p12 = pnand %p789_p8, %p749_p13  ;;  %p798_p7 = por %p797_p5, %p796_p3 }
  0x37   : > { %p792_p0 = pneg %p791_p12 }
  0x39   : > { %p799_p10 = pnand %p798_p7, %p792_p0 }
  0x3b   : > { %802 = shalt.err (!%p799_p10)
}
  0x3c   : > { %669 = dma.hbm_to_vmem [thread:$0]  (!%p997_p11), %s1194_s2, 128, %s1001_s24, [#allocation6]  }
  0x3d   : > { %p25_p13 = scmp.eq.s32.totalorder %s24_s27, 0  ;;  %s27_s6 = sadd.s32 1, %s899_s14 }
  0x3e   : > { %p34_p9 = scmp.ne.s32.totalorder %s899_s14, %s895_s13  ;;  %p35_p2 = scmp.eq.s32.totalorder %s903_s15, 0 }
  0x3f   : > { %s1063_s25 = scalar_select %p25_p13, %s899_s14, %s27_s6  }
  0x40   : > { %p36_p1 = por %p35_p2, %p34_p9  ;;  %p1203_p4 = scmp.eq.s32.totalorder %s969_s16, 1 }
  0x41   : > { %p680_p8 = scmp.lt.s32.totalorder %s903_s15, 2  ;;  %s154_s8 = sand.u32 1, %s899_s14  }
  0x42   : > { %p1067_p6 = por %p1203_p4, %p34_p9  ;;  %s648_s9 = smul.u32 12, %s154_s8 }
  0x43   : > { %s649_s10 = smul.u32 192, %s903_s15  ;;  %p1074_p12 = pnand %p680_p8, %p36_p1 }
  0x44   : > { %s158_s21 = scalar_lea.vmem [#allocation2], %s648_s9  ;;  %s155_s28 = scalar_lea.sflag [#allocation3], %s154_s8 }
  0x45   : > { %s1081_s17 = scalar_lea.hbm %s1192_s0, %s649_s10  ;;  %s166_s23 = sshll.u32 %s158_s21, 4  ;;  %s1083_s23 = int_to_ptr.vmem [resolvable:$true] %s166_s23 }
  0x46   : > { %s803_s29 = scalar_lea.hbm %s1081_s17, 192  ;;  %p805_p0 = pneg %p1074_p12 }
  0x47   : > { %p804_p11 = scmp.ne.s32.totalorder %s1081_s17, %s803_s29  ;;  %s808_s4 = scalar_lea.hbm %s1192_s0, 384 }
  0x48   : > { %p809_p7 = scmp.lt.u32.totalorder %s1081_s17, %s1192_s0  ;;  %p810_p10 = scmp.lt.u32.totalorder %s808_s4, %s803_s29 }
  0x49   : > { %p806_p3 = pnand %p805_p0, %p804_p11  ;;  %p812_p9 = scmp.lt.u32.totalorder %s803_s29, %s1081_s17 }
  0x4a   : > { %p811_p13 = por %p810_p10, %p809_p7 }
  0x4b   : > { %p807_p5 = pneg %p806_p3 }
  0x4c   : > { %p813_p2 = por %p812_p9, %p811_p13 }
  0x4e   : > { %p814_p1 = pnand %p813_p2, %p807_p5 }
  0x50   : > { %817 = shalt.err (!%p814_p1)
}
  0x51   : > { %s818_s8 = scalar_lea.vmem %s1083_s23, 192  ;;  %s907_s9 = smov [#allocation2]  }
  0x52   : > { %p819_p4 = scmp.ne.s32.totalorder %s1083_s23, %s818_s8  ;;  %s823_s10 = sshll.u32 %s907_s9, 4  ;;  %s824_s10 = int_to_ptr.vmem [resolvable:$false] %s823_s10 }
  0x53   : > { %s825_s24 = scalar_lea.vmem %s824_s10, 384  ;;  %p826_p3 = scmp.lt.s32.totalorder %s1083_s23, %s824_s10 }
  0x54   : > { %p821_p8 = pnand %p819_p4, %p805_p0  ;;  %p827_p7 = scmp.lt.s32.totalorder %s825_s24, %s818_s8 }
  0x56   : > { %p822_p11 = pneg %p821_p8  ;;  %p828_p10 = por %p827_p7, %p826_p3 }
  0x58   : > { %p829_p13 = pnand %p828_p10, %p822_p11 }
  0x5a   : > { %832 = shalt.err (!%p829_p13)
}
  0x5b   : > { %673 = dma.hbm_to_vmem [thread:$0]  (!%p1074_p12), %s1081_s17, 192, %s1083_s23, %s155_s28  }
  0x5c   : > { %p1206_p5 = scmp.ne.s32.totalorder %s1201_s20, 0 }
  0x5d   : > { %s1113_s27 = sand.u32 (!%p1206_p5), 1, %s895_s13   ;;  %p1207_p0 = scmp.ne.s32.totalorder (!%p1206_p5), %s1199_s18, 0 }
  0x5e   : > { %175 = sbr.rel (%p1206_p5) target bundleno = 625 (0x271), region = 32  ;;  %s178_s29 = scalar_lea.sflag (!%p1206_p5), [#allocation3], %s1113_s27 }
  0x5f   : > { %s650_s21 = smul.u32 (!%p1206_p5), 12, %s1113_s27 }
  0x61   : > { %s1117_s30 = scalar_lea.vmem (!%p1206_p5), [#allocation2], %s650_s21 }
  0x65   : > { %878 = dma.done.wait (%p1207_p0), %s178_s29, 192  }
  0x66   : > { %880 = vsyncadd (%p1207_p0), %s178_s29, 4294967104  ;;  %p1208_p12 = scmp.eq.s32.totalorder %s969_s16, 0 }
  0x68   : > { %882 = dma.done.wait (%p1208_p12), [#allocation6], 192   ;;  %p1209_p9 = pmov %p1208_p12 }
  0x69   : > { %v908_v0 = vmov 1   ;;  %v909_v1 = vmov 3   ;;  %v214_v2 = vld [vmem:[#allocation5] sm:$0xf]  ;;  %v910_v3 = vmov 2   ;;  %v911_v4 = vmov 4  }
  0x6a   : > { %884 = vsyncadd (%p1209_p9), [#allocation6], 4294967104  ;;  %737 = vset.pattern.permute.xlu0 %v908_v0  ;;  %739 = vset.pattern.permute.xlu1 %v909_v1  ;;  %v912_v5 = vmov 5   ;;  %v913_v6 = vmov 6   ;;  %v914_v7 = vmov 7   ;;  %v915_v8 = vmov 0  }
  0x6b   : > { %229 = vperm.xlu0 %737, %v214_v2   ;;  %282 = vperm.xlu1 %739, %v214_v2   ;;  %v916_v9 = vmov 8   ;;  %v917_v10 = vmov 839922192   ;;  %v222_v12 = vlaneseq  ;;  %v212_v17 = vld [vmem:[%s1117_s30] sm:$0xff]  ;;  %v213_v21 = vld [vmem:[%s1117_s30 + $0x8] sm:$0xf] }
  0x6c   : > { %v220_v11 = vunpack.c.l.s4 %v917_v10  ;;  %s918_s18 = smov 127   ;;  %s919_s20 = smov 126   ;;  %v925_v53 = vmov 0.0   ;;  %v1129_v54 = vld [vmem:[#allocation7] sm:$0xff]  ;;  %vm249_vm0 = vcmask 1043456   ;;  %vm251_vm1 = vcmask 1039360  }
  0x6d   : > { %v223_v14 = vshrl.u32 %v222_v12, 7  ;;  %s920_s11 = smov 112   ;;  %s921_s17 = smov 111   ;;  %516 = vmatprep.mubr.f32.mxu0 %v925_v53  ;;  %vm277_vm2 = vcmask 1031168   ;;  %vm303_vm3 = vcmask 916480   ;;  %vm329_vm4 = vcmask 908288  }
  0x6e   : > { %v221_v13 = vunpack.c.0.s8 %v220_v11  ;;  %s922_s23 = smov 110   ;;  %s923_s28 = smov 96   ;;  %vm355_vm5 = vcmask 900096   ;;  %vm381_vm6 = vcmask 785408   ;;  %vm407_vm7 = vcmask 777216  }
  0x6f   : > { %738 = vset.pattern.permute.xlu0 %v910_v3  ;;  %740 = vset.pattern.permute.xlu1 %v911_v4  ;;  %s924_s22 = smov 95   ;;  %s926_s4 = smov 94   ;;  %vm433_vm8 = vcmask 769024   ;;  %vm445_vm9 = vcmask 31744  }
  0x70   : > { %256 = vperm.xlu0 %738, %v214_v2   ;;  %308 = vperm.xlu1 %740, %v214_v2   ;;  %v224_v15 = vsub.s32 %v221_v13, %v223_v14  ;;  %s638_s5 = sshll.u32 %s1113_s27, 4  ;;  %s647_s6 = sshll.u32 %s969_s16, 8 }
  0x71   : > { %s211_s8 = scalar_lea.vmem [#allocation8], %s638_s5  ;;  %s1148_s21 = scalar_lea.hbm %s1195_s3, %s647_s6 }
  0x72   : > { %s540_s9 = sshll.u32 %s211_s8, 4  ;;  %s526_s29 = scalar_lea.sflag [#allocation4], %s1113_s27  ;;  %s1150_s9 = int_to_ptr.vmem [resolvable:$true] %s540_s9 }
  0x73   : > { %s833_s16 = scalar_lea.vmem %s1150_s9, 256  ;;  %s927_s30 = smov [#allocation8]  }
  0x74   : > { %741 = vset.pattern.permute.xlu1 %v912_v5  ;;  %742 = vset.pattern.permute.xlu0 %v913_v6  ;;  %p834_p2 = scmp.ne.s32.totalorder %s1150_s9, %s833_s16 }
  0x75   : > { %334 = vperm.xlu1 %741, %v214_v2   ;;  %360 = vperm.xlu0 %742, %v214_v2  }
  0x76   : > { %p835_p1 = pnand %p834_p2, %p1067_p6 }
  0x78   : > { %p836_p4 = pneg %p835_p1 }
  0x79   : > { %743 = vset.pattern.permute.xlu1 %v914_v7  ;;  %745 = vset.pattern.permute.xlu0 %v915_v8 }
  0x7a   : > { %386 = vperm.xlu1 %743, %v214_v2   ;;  %217 = vperm.xlu0 %745, %v214_v2  }
  0x7e   : > { %744 = vset.pattern.permute.xlu1 %v916_v9  ;;  %746 = vset.pattern.permute.xlu0 %v911_v4 }
  0x7f   : > { %412 = vperm.xlu1 %744, %v214_v2  }
  0xea   : > { %v230_v16 = vpop.permute.xlu0 %229  ;;  %v283_v18 = vpop.permute.xlu1 %282 }
  0xeb   : > { %v237_v19 = vrot.slane %v230_v16, %v224_v15  ;;  %v290_v25 = vrot.slane %v283_v18, %v224_v15 }
  0xed   : > { %v239_v20 = vmul.f32 %v237_v19, %v212_v17  ;;  %v240_v26 = vmul.f32 %v237_v19, %v213_v21  ;;  %v292_v29 = vmul.f32 %v290_v25, %v212_v17  ;;  %v293_v35 = vmul.f32 %v290_v25, %v213_v21 }
  0xef   : > { %243 = vrot.lane.b32.xlu1 %v239_v20, %s918_s18  ;;  %v257_v22 = vpop.permute.xlu0 %256  ;;  %v309_v23 = vpop.permute.xlu1 %308 }
  0xf0   : > { %v264_v24 = vrot.slane %v257_v22, %v224_v15  ;;  %v316_v30 = vrot.slane %v309_v23, %v224_v15 }
  0xf2   : > { %v266_v27 = vmul.f32 %v264_v24, %v212_v17  ;;  %v267_v28 = vmul.f32 %v264_v24, %v213_v21  ;;  %v318_v33 = vmul.f32 %v316_v30, %v212_v17  ;;  %v319_v38 = vmul.f32 %v316_v30, %v213_v21 }
  0xf3   : > { %245 = vrot.lane.b32.xlu1 %v240_v26, %s918_s18  ;;  %s837_s18 = sshll.u32 %s927_s30, 4  ;;  %s838_s18 = int_to_ptr.vmem [resolvable:$false] %s837_s18 }
  0xf4   : > { %270 = vrot.lane.b32.xlu0 %v266_v27, %s919_s20  ;;  %v335_v31 = vpop.permute.xlu1 %334  ;;  %v361_v32 = vpop.permute.xlu0 %360  ;;  %p840_p8 = scmp.lt.s32.totalorder %s1150_s9, %s838_s18 }
  0xf5   : > { %v342_v34 = vrot.slane %v335_v31, %v224_v15  ;;  %v368_v41 = vrot.slane %v361_v32, %v224_v15 }
  0xf7   : > { %272 = vrot.lane.b32.xlu1 %v267_v28, %s919_s20  ;;  %v344_v40 = vmul.f32 %v342_v34, %v212_v17  ;;  %v345_v43 = vmul.f32 %v342_v34, %v213_v21  ;;  %v370_v44 = vmul.f32 %v368_v41, %v212_v17  ;;  %v371_v47 = vmul.f32 %v368_v41, %v213_v21  ;;  %s839_s20 = scalar_lea.vmem %s838_s18, 512 }
  0xf8   : > { %296 = vrot.lane.b32.xlu0 %v292_v29, %s920_s11  ;;  %p841_p11 = scmp.lt.s32.totalorder %s839_s20, %s833_s16 }
  0xf9   : > { %v218_v36 = vpop.permute.xlu0 %217  ;;  %v387_v39 = vpop.permute.xlu1 %386 }
  0xfa   : > { %v225_v37 = vrot.slane %v218_v36, %v224_v15  ;;  %v394_v45 = vrot.slane %v387_v39, %v224_v15  ;;  %p842_p3 = por %p841_p11, %p840_p8 }
  0xfb   : > { %298 = vrot.lane.b32.xlu1 %v293_v35, %s920_s11 }
  0xfc   : > { %322 = vrot.lane.b32.xlu0 %v318_v33, %s921_s17  ;;  %v227_v42 = vmul.f32 %v225_v37, %v212_v17  ;;  %v396_v48 = vmul.f32 %v394_v45, %v212_v17  ;;  %v397_v50 = vmul.f32 %v394_v45, %v213_v21  ;;  %p843_p7 = pnand %p842_p3, %p836_p4 }
  0xfe   : > { %v413_v46 = vpop.permute.xlu1 %412 }
  0xff   : > { %324 = vrot.lane.b32.xlu1 %v319_v38, %s921_s17  ;;  %v420_v49 = vrot.slane %v413_v46, %v224_v15 }
 0x100   : > { %348 = vrot.lane.b32.xlu0 %v344_v40, %s922_s23 }
 0x101   : > { %v422_v51 = vmul.f32 %v420_v49, %v212_v17  ;;  %v423_v52 = vmul.f32 %v420_v49, %v213_v21 }
 0x103   : > { %350 = vrot.lane.b32.xlu1 %v345_v43, %s922_s23 }
 0x104   : > { %374 = vrot.lane.b32.xlu0 %v370_v44, %s923_s28 }
 0x107   : > { %376 = vrot.lane.b32.xlu1 %v371_v47, %s923_s28 }
 0x108   : > { %400 = vrot.lane.b32.xlu0 %v396_v48, %s924_s22 }
 0x10b   : > { %402 = vrot.lane.b32.xlu1 %v397_v50, %s924_s22 }
 0x10c   : > { %426 = vrot.lane.b32.xlu0 %v422_v51, %s926_s4 }
 0x10f   : > { %428 = vrot.lane.b32.xlu1 %v423_v52, %s926_s4 }
 0x110   : > { %440 = vperm.xlu0 %746, %v1129_v54  }
 0x161   : > { %v244_v55 = vpop.permute.xlu1 %243 }
 0x162   : > { %v247_v63 = vrot.slane %v244_v55, 4 }
 0x165   : > { %v246_v56 = vpop.permute.xlu1 %245 }
 0x166   : > { %v271_v57 = vpop.permute.xlu0 %270  ;;  %v248_v61 = vrot.slane %v246_v56, 4 }
 0x167   : > { %v274_v0 = vrot.slane %v271_v57, 4 }
 0x168   : > { %v250_v3 = vsel %vm249_vm0, %v247_v63, %v248_v61 }
 0x169   : > { %v273_v58 = vpop.permute.xlu1 %272  ;;  %v252_v10 = vsel %vm251_vm1, %v244_v55, %v250_v3 }
 0x16a   : > { %v297_v59 = vpop.permute.xlu0 %296  ;;  %v275_v1 = vrot.slane %v273_v58, 4  ;;  %v254_v17 = vadd.f32 %v252_v10, %v227_v42 }
 0x16b   : > { %v300_v7 = vrot.slane %v297_v59, 4 }
 0x16c   : > { %v276_v6 = vsel %vm249_vm0, %v274_v0, %v275_v1 }
 0x16d   : > { %v299_v60 = vpop.permute.xlu1 %298  ;;  %v278_v16 = vsel %vm277_vm2, %v271_v57, %v276_v6 }
 0x16e   : > { %v323_v62 = vpop.permute.xlu0 %322  ;;  %v301_v4 = vrot.slane %v299_v60, 4  ;;  %v280_v22 = vadd.f32 %v278_v16, %v254_v17 }
 0x16f   : > { %v326_v8 = vrot.slane %v323_v62, 4 }
 0x170   : > { %v302_v12 = vsel %vm249_vm0, %v300_v7, %v301_v4 }
 0x171   : > { %v325_v2 = vpop.permute.xlu1 %324  ;;  %v304_v20 = vsel %vm303_vm3, %v297_v59, %v302_v12 }
 0x172   : > { %v349_v5 = vpop.permute.xlu0 %348  ;;  %v327_v9 = vrot.slane %v325_v2, 4  ;;  %v306_v27 = vadd.f32 %v304_v20, %v280_v22 }
 0x173   : > { %v352_v13 = vrot.slane %v349_v5, 4 }
 0x174   : > { %v328_v18 = vsel %vm249_vm0, %v326_v8, %v327_v9 }
 0x175   : > { %v351_v11 = vpop.permute.xlu1 %350  ;;  %v330_v26 = vsel %vm329_vm4, %v323_v62, %v328_v18 }
 0x176   : > { %v353_v14 = vrot.slane %v351_v11, 4  ;;  %v375_v15 = vpop.permute.xlu0 %374  ;;  %v332_v32 = vadd.f32 %v330_v26, %v306_v27 }
 0x177   : > { %v378_v19 = vrot.slane %v375_v15, 4 }
 0x178   : > { %v354_v23 = vsel %vm249_vm0, %v352_v13, %v353_v14 }
 0x179   : > { %v377_v21 = vpop.permute.xlu1 %376  ;;  %v356_v30 = vsel %vm355_vm5, %v349_v5, %v354_v23 }
 0x17a   : > { %v379_v24 = vrot.slane %v377_v21, 4  ;;  %v401_v25 = vpop.permute.xlu0 %400  ;;  %v358_v36 = vadd.f32 %v356_v30, %v332_v32 }
 0x17b   : > { %v404_v29 = vrot.slane %v401_v25, 4 }
 0x17c   : > { %v380_v28 = vsel %vm249_vm0, %v378_v19, %v379_v24 }
 0x17d   : > { %v403_v31 = vpop.permute.xlu1 %402  ;;  %v382_v35 = vsel %vm381_vm6, %v375_v15, %v380_v28 }
 0x17e   : > { %v405_v33 = vrot.slane %v403_v31, 4  ;;  %v427_v34 = vpop.permute.xlu0 %426  ;;  %v384_v42 = vadd.f32 %v382_v35, %v358_v36 }
 0x17f   : > { %v430_v38 = vrot.slane %v427_v34, 4 }
 0x180   : > { %v406_v37 = vsel %vm249_vm0, %v404_v29, %v405_v33 }
 0x181   : > { %v429_v39 = vpop.permute.xlu1 %428  ;;  %v408_v40 = vsel %vm407_vm7, %v401_v25, %v406_v37 }
 0x182   : > { %v431_v41 = vrot.slane %v429_v39, 4  ;;  %v410_v44 = vadd.f32 %v408_v40, %v384_v42 }
 0x184   : > { %v432_v43 = vsel %vm249_vm0, %v430_v38, %v431_v41 }
 0x185   : > { %v434_v45 = vsel %vm433_vm8, %v427_v34, %v432_v43 }
 0x186   : > { %v436_v46 = vadd.f32 %v434_v45, %v410_v44 }
 0x188   : > { %v444_v47 = vcombine.high %v436_v46, %v436_v46 }
 0x18a   : > { %639 = vmatprep.subr.msk.mxu0 %vm249_vm0, %v444_v47 }
 0x18b   : > { %640 = vmatpush1.msk.msra.mxu0 %vm249_vm0, %v436_v46 }
 0x18c   : > { %641 = vmatmul.mubr.msk.f32.vlgmr.msra.gmra.mrb[0].mxu0 %vm445_vm9, %v1129_v54 }
 0x18f   : > { %v441_v48 = vpop.permute.xlu0 %440 }
 0x25f   : > { %v518_v49 = vpop.f32.mrb[0].mxu0 }
 0x260   : > { %v519_v50 = vadd.f32 %v518_v49, %v441_v48  ;;  %v520_v51 = vpop.f32.mrb[1].mxu0 }
 0x261   : > { %v521_v52 = vadd.f32 %v520_v51, %v441_v48 }
 0x262   : > { %523 = vst [vmem:[%s211_s8] sm:$0xff] %v519_v50 }
 0x263   : > { %524 = vst [vmem:[%s211_s8 + $0x8] sm:$0xff] %v521_v52 }
 0x264   : > { %846 = shalt.err (!%p843_p7)
}
 0x265   : > { %s847_s27 = scalar_lea.hbm %s1148_s21, 256  ;;  %s851_s23 = scalar_lea.hbm %s1195_s3, 512 }
 0x266   : > { %p848_p10 = scmp.ne.s32.totalorder %s1148_s21, %s847_s27  ;;  %p852_p0 = scmp.lt.u32.totalorder %s1148_s21, %s1195_s3 }
 0x267   : > { %p853_p12 = scmp.lt.u32.totalorder %s851_s23, %s847_s27  ;;  %p855_p2 = scmp.lt.u32.totalorder %s847_s27, %s1148_s21 }
 0x268   : > { %p849_p13 = pnand %p848_p10, %p1067_p6 }
 0x269   : > { %p854_p9 = por %p853_p12, %p852_p0 }
 0x26a   : > { %p850_p5 = pneg %p849_p13 }
 0x26b   : > { %p856_p1 = por %p855_p2, %p854_p9 }
 0x26d   : > { %p857_p4 = pnand %p856_p1, %p850_p5 }
 0x26f   : > { %860 = shalt.err (!%p857_p4)
}
 0x270   : > { %661 = dma.vmem_to_hbm [thread:$0]  (%p1067_p6), %s1150_s9, 256, %s1148_s21, %s526_s29  }
 0x271 PF: > { %s552_s4 = sand.u32 1, %s891_s12   ;;  %p1210_p8 = scmp.ne.s32.totalorder %s1200_s19, 0 }
 0x272   : > { %p1211_p11 = scmp.ge.s32.totalorder %s903_s15, 2  ;;  %s553_s5 = scalar_lea.sflag [#allocation4], %s552_s4 }
 0x274   : > { %p675_p3 = pnand %p1211_p11, %p1210_p8 }
 0x276   : > { %886 = dma.done.wait (!%p675_p3), %s553_s5, 256  }
 0x277   : > { %888 = vsyncadd (!%p675_p3), %s553_s5, 4294967040  ;;  %p17_p7 = scmp.ge.s32.totalorder %s1004_s26, 4   ;;  %s1212_s12 = smov %s895_s13 }
 0x278   : > { %s1213_s13 = smov %s899_s14  ;;  %s1214_s14 = smov %s1063_s25 }
 0x279   : > { %s1215_s15 = smov %s1004_s26  ;;  %19 = sbr.rel (!%p17_p7) target bundleno = 6 (0x6), region = 85 }
 0x280   :  { %558 = vsyncpa [#allocation3], 1 }
 0x281   :  { %560 = vsyncpa [#allocation3 + $0x1], 1 }
 0x282   :  { %561 = vsyncpa [#allocation6], 1 }
 0x283   :  { %562 = vsyncpa [#allocation4], 1 }
 0x284   :  { %564 = vsyncpa [#allocation4 + $0x1], 1 }

</bundles_post_ra>
